<compile_context>
chip_gen: v7x
topology: tpu7x:2x2x1
jax: 0.10.0
libtpu: 0.0.40
codegen_flags: <defaults>
</compile_context>

<pallas_src>
import functools
import math

import jax
import jax.numpy as jnp
from jax import lax
from jax.experimental import pallas as pl
from jax.experimental.pallas import tpu as pltpu


def _round_up(x, m):
    return ((x + m - 1) // m) * m


def _default_tanh_dtype():
    """bf16 tanh on chips with a bf16 EUP (v6e / v7x); f32 elsewhere (v5e & older)."""
    try:
        kind = jax.devices()[0].device_kind.lower()
    except Exception:
        return jnp.float32
    if any(tag in kind for tag in ("v6", "v7", "7x")):
        return jnp.bfloat16
    return jnp.float32


def _state_fn_kernel(x_ref, w1_ref, b1_ref, w2_ref, b2_ref, w3t_ref, b3_ref, o_ref,
                     *, tanh_dtype):
    """One batch tile: x (tm, S) f32 -> lane-dense output row (1, tm) f32."""
    x = x_ref[...]                                                  # (tm, S) f32
    pre1 = jnp.dot(x, w1_ref[...], preferred_element_type=jnp.float32) + b1_ref[...]
    h1 = jnp.tanh(pre1.astype(tanh_dtype)).astype(jnp.float32)      # (tm, H1)
    pre2 = jnp.dot(h1, w2_ref[...], preferred_element_type=jnp.float32) + b2_ref[...]
    h2 = jnp.tanh(pre2.astype(tanh_dtype)).astype(jnp.float32)      # (tm, H2)
    # Final layer transposed: (1,H2) x (tm,H2) contracting last dims -> (1, tm),
    # so the store is a full, unmasked lane-dense row (same contraction pattern as
    # q @ k.T in flash attention; no large transpose of h2 is materialized).
    out_t = lax.dot_general(
        w3t_ref[...], h2,
        dimension_numbers=(((1,), (1,)), ((), ())),
        preferred_element_type=jnp.float32,
    ) + b3_ref[...]                                                 # (1, tm)
    o_ref[...] = out_t.astype(o_ref.dtype)


def state_function_forward(states, params, *, block_rows=2048, tanh_dtype=None):
    """states: (B, state_dim) float32 -> (B, 1) float32."""
    w1, b1, w2, b2, w3, b3 = params
    B, S = states.shape
    H1 = w1.shape[1]
    H2 = w2.shape[1]
    if tanh_dtype is None:
        tanh_dtype = _default_tanh_dtype()

    # Batch tile: rows map to output *lanes*, so tm must be a multiple of 128
    # (which also satisfies the 8-row sublane rule on the input tile).  Cap it at
    # ~half the batch so the grid has >= 2 steps when possible (v7x: lets the
    # "parallel" axis shard across both TensorCores).
    tm = max(128, _round_up(min(block_rows, pl.cdiv(max(B, 1), 2)), 128))
    grid = (pl.cdiv(B, tm),)
    n_lanes = grid[0] * tm          # padded output lanes (allocated, never a copy of states)

    w3t = w3.reshape(H2, 1).T       # (1, H2) -- tiny wrapper-side transpose
    b3r = b3.reshape(1, 1)

    def resident(shape):
        # Same block every grid step -> stays VMEM-resident, no per-step re-DMA.
        return pl.BlockSpec(shape, lambda i: (0, 0))

    cost = pl.CostEstimate(
        flops=2 * B * (S * H1 + H1 * H2 + H2),
        transcendentals=B * (H1 + H2),
        bytes_accessed=B * S * 4 + B * 4
        + 4 * (S * H1 + H1 + H1 * H2 + H2 + H2 + 1),
    )

    out = pl.pallas_call(
        functools.partial(_state_fn_kernel, tanh_dtype=tanh_dtype),
        out_shape=jax.ShapeDtypeStruct((1, n_lanes), jnp.float32),
        grid=grid,
        in_specs=[
            pl.BlockSpec((tm, S), lambda i: (i, 0)),   # streamed state tiles (ragged tail OK)
            resident((S, H1)),
            resident((1, H1)),
            resident((H1, H2)),
            resident((1, H2)),
            resident((1, H2)),                         # w3^T
            resident((1, 1)),                          # b3
        ],
        out_specs=pl.BlockSpec((1, tm), lambda i: (0, i)),   # lane-dense output row
        compiler_params=pltpu.CompilerParams(
            dimension_semantics=("parallel",),
        ),
        cost_estimate=cost,
    )(states, w1, b1, w2, b2, w3t, b3r)

    # Drop the ragged-tail lanes (cheap: B*4 bytes), return (B, 1).
    return out[0, :B].reshape(B, 1)


def init_params(key, state_dim, hidden_units=(64, 64)):
    """Deterministic init mimicking torch.nn.Linear (U(-1/sqrt(fan_in), +))."""
    dims = [state_dim, *hidden_units, 1]
    params = []
    for i in range(len(dims) - 1):
        fan_in, fan_out = dims[i], dims[i + 1]
        key, kw, kb = jax.random.split(key, 3)
        bound = 1.0 / math.sqrt(fan_in)
        w = jax.random.uniform(kw, (fan_in, fan_out), jnp.float32, -bound, bound)
        b = jax.random.uniform(kb, (1, fan_out), jnp.float32, -bound, bound)
        params += [w, b]
    return tuple(params)


def ref_forward(states, params):
    """Pure-JAX f32 reference (matches the PyTorch module's math)."""
    w1, b1, w2, b2, w3, b3 = params
    h1 = jnp.tanh(states @ w1 + b1)
    h2 = jnp.tanh(h1 @ w2 + b2)
    return h2 @ w3 + b3


if __name__ == "__main__":
    key = jax.random.PRNGKey(0)
    k_x, k_p = jax.random.split(key)

    # Small shapes consistent with the module: batch=4, state_dim=32.
    batch, state_dim = 4, 32
    states = jax.random.normal(k_x, (batch, state_dim), jnp.float32)
    params = init_params(k_p, state_dim, hidden_units=(64, 64))

    tanh_dtype = _default_tanh_dtype()
    # Loose tolerance when tanh runs in bf16 (v6e/v7x); tighter on the f32 path.
    tol = 3e-2 if tanh_dtype == jnp.bfloat16 else 1e-2

    out = state_function_forward(states, params)
    jax.block_until_ready(out)
    ref = ref_forward(states, params)
    assert out.shape == (batch, 1)
    assert jnp.allclose(out, ref, atol=tol, rtol=tol), "mismatch vs reference (small batch)"

    # Exercise the multi-tile grid + ragged last-tile path (no padding copy).
    batch2 = 1000
    states2 = jax.random.normal(jax.random.PRNGKey(1), (batch2, state_dim), jnp.float32)
    out2 = state_function_forward(states2, params)
    jax.block_until_ready(out2)
    ref2 = ref_forward(states2, params)
    assert out2.shape == (batch2, 1)
    assert jnp.allclose(out2, ref2, atol=tol, rtol=tol), "mismatch vs reference (tiled batch)"

    print("KERNEL_OK")
</pallas_src>

<mosaic_0001>
module attributes {stable_mosaic.version = 11 : i64} {
  func.func @_state_fn_kernel(%arg0: i32, %arg1: memref<128x32xf32, #tpu.memory_space<vmem>>, %arg2: memref<32x64xf32, #tpu.memory_space<vmem>>, %arg3: memref<1x64xf32, #tpu.memory_space<vmem>>, %arg4: memref<64x64xf32, #tpu.memory_space<vmem>>, %arg5: memref<1x64xf32, #tpu.memory_space<vmem>>, %arg6: memref<1x64xf32, #tpu.memory_space<vmem>>, %arg7: memref<1x1xf32, #tpu.memory_space<vmem>>, %arg8: memref<1x128xf32, #tpu.memory_space<vmem>>) attributes {dimension_semantics = [#tpu.dimension_semantics<parallel>], iteration_bounds = array<i64: 1>, scalar_prefetch = 0 : i64, scratch_operands = 0 : i64, tpu.core_type = #tpu.core_type<tc>, window_params = [{transform_indices = @transform_0, window_bounds = array<i64: 128, 32>}, {pipeline_mode = #tpu.pipeline_mode<synchronous>, transform_indices = @transform_1, window_bounds = array<i64: 32, 64>}, {pipeline_mode = #tpu.pipeline_mode<synchronous>, transform_indices = @transform_2, window_bounds = array<i64: 1, 64>}, {pipeline_mode = #tpu.pipeline_mode<synchronous>, transform_indices = @transform_3, window_bounds = array<i64: 64, 64>}, {pipeline_mode = #tpu.pipeline_mode<synchronous>, transform_indices = @transform_4, window_bounds = array<i64: 1, 64>}, {pipeline_mode = #tpu.pipeline_mode<synchronous>, transform_indices = @transform_5, window_bounds = array<i64: 1, 64>}, {pipeline_mode = #tpu.pipeline_mode<synchronous>, transform_indices = @transform_6, window_bounds = array<i64: 1, 1>}, {transform_indices = @transform_7, window_bounds = array<i64: 1, 128>}]} {
    %c0 = arith.constant 0 : index
    %c0_0 = arith.constant 0 : index
    %0 = vector.load %arg1[%c0, %c0_0] : memref<128x32xf32, #tpu.memory_space<vmem>>, vector<128x32xf32>
    %c0_1 = arith.constant 0 : index
    %c0_2 = arith.constant 0 : index
    %1 = vector.load %arg2[%c0_1, %c0_2] : memref<32x64xf32, #tpu.memory_space<vmem>>, vector<32x64xf32>
    %cst = arith.constant dense<0.000000e+00> : vector<128x64xf32>
    %2 = tpu.matmul %0, %1, %cst {dimension_numbers = #tpu.dot_dimension_numbers<[1], [0], [0], [1], [0, 0, 1, 1], [], []>} : vector<128x32xf32>, vector<32x64xf32>, vector<128x64xf32> -> vector<128x64xf32>
    %c0_3 = arith.constant 0 : index
    %c0_4 = arith.constant 0 : index
    %3 = vector.load %arg3[%c0_3, %c0_4] : memref<1x64xf32, #tpu.memory_space<vmem>>, vector<1x64xf32>
    %4 = vector.broadcast %3 : vector<1x64xf32> to vector<128x64xf32>
    %5 = arith.addf %2, %4 : vector<128x64xf32>
    %6 = math.tanh %5 : vector<128x64xf32>
    %c0_5 = arith.constant 0 : index
    %c0_6 = arith.constant 0 : index
    %7 = vector.load %arg4[%c0_5, %c0_6] : memref<64x64xf32, #tpu.memory_space<vmem>>, vector<64x64xf32>
    %cst_7 = arith.constant dense<0.000000e+00> : vector<128x64xf32>
    %8 = tpu.matmul %6, %7, %cst_7 {dimension_numbers = #tpu.dot_dimension_numbers<[1], [0], [0], [1], [0, 0, 1, 1], [], []>} : vector<128x64xf32>, vector<64x64xf32>, vector<128x64xf32> -> vector<128x64xf32>
    %c0_8 = arith.constant 0 : index
    %c0_9 = arith.constant 0 : index
    %9 = vector.load %arg5[%c0_8, %c0_9] : memref<1x64xf32, #tpu.memory_space<vmem>>, vector<1x64xf32>
    %10 = vector.broadcast %9 : vector<1x64xf32> to vector<128x64xf32>
    %11 = arith.addf %8, %10 : vector<128x64xf32>
    %12 = math.tanh %11 : vector<128x64xf32>
    %c0_10 = arith.constant 0 : index
    %c0_11 = arith.constant 0 : index
    %13 = vector.load %arg6[%c0_10, %c0_11] : memref<1x64xf32, #tpu.memory_space<vmem>>, vector<1x64xf32>
    %cst_12 = arith.constant dense<0.000000e+00> : vector<1x128xf32>
    %14 = tpu.matmul %13, %12, %cst_12 {dimension_numbers = #tpu.dot_dimension_numbers<[1], [1], [0], [0], [0, 0, 1, 0], [], []>} : vector<1x64xf32>, vector<128x64xf32>, vector<1x128xf32> -> vector<1x128xf32>
    %c0_13 = arith.constant 0 : index
    %c0_14 = arith.constant 0 : index
    %15 = vector.load %arg7[%c0_13, %c0_14] : memref<1x1xf32, #tpu.memory_space<vmem>>, vector<1x1xf32>
    %16 = vector.broadcast %15 : vector<1x1xf32> to vector<1x128xf32>
    %17 = arith.addf %14, %16 : vector<1x128xf32>
    %c0_15 = arith.constant 0 : index
    %c0_16 = arith.constant 0 : index
    %18 = vector.load %arg8[%c0_15, %c0_16] : memref<1x128xf32, #tpu.memory_space<vmem>>, vector<1x128xf32>
    tpu.vector_store %arg8[%c0_15, %c0_16], %17 {strides = array<i32>} : memref<1x128xf32, #tpu.memory_space<vmem>>, vector<1x128xf32>,
    return
  }
  func.func @transform_0(%arg0: i32) -> (i32, i32) {
    %c0_i32 = arith.constant 0 : i32
    %c0_i32_0 = arith.constant 0 : i32
    return %arg0, %c0_i32 : i32, i32
  }
  func.func @transform_1(%arg0: i32) -> (i32, i32) {
    %c0_i32 = arith.constant 0 : i32
    %c0_i32_0 = arith.constant 0 : i32
    %c0_i32_1 = arith.constant 0 : i32
    return %c0_i32, %c0_i32_0 : i32, i32
  }
  func.func @transform_2(%arg0: i32) -> (i32, i32) {
    %c0_i32 = arith.constant 0 : i32
    %c0_i32_0 = arith.constant 0 : i32
    %c0_i32_1 = arith.constant 0 : i32
    return %c0_i32, %c0_i32_0 : i32, i32
  }
  func.func @transform_3(%arg0: i32) -> (i32, i32) {
    %c0_i32 = arith.constant 0 : i32
    %c0_i32_0 = arith.constant 0 : i32
    %c0_i32_1 = arith.constant 0 : i32
    return %c0_i32, %c0_i32_0 : i32, i32
  }
  func.func @transform_4(%arg0: i32) -> (i32, i32) {
    %c0_i32 = arith.constant 0 : i32
    %c0_i32_0 = arith.constant 0 : i32
    %c0_i32_1 = arith.constant 0 : i32
    return %c0_i32, %c0_i32_0 : i32, i32
  }
  func.func @transform_5(%arg0: i32) -> (i32, i32) {
    %c0_i32 = arith.constant 0 : i32
    %c0_i32_0 = arith.constant 0 : i32
    %c0_i32_1 = arith.constant 0 : i32
    return %c0_i32, %c0_i32_0 : i32, i32
  }
  func.func @transform_6(%arg0: i32) -> (i32, i32) {
    %c0_i32 = arith.constant 0 : i32
    %c0_i32_0 = arith.constant 0 : i32
    %c0_i32_1 = arith.constant 0 : i32
    return %c0_i32, %c0_i32_0 : i32, i32
  }
  func.func @transform_7(%arg0: i32) -> (i32, i32) {
    %c0_i32 = arith.constant 0 : i32
    %c0_i32_0 = arith.constant 0 : i32
    return %c0_i32, %arg0 : i32, i32
  }
}

</mosaic_0001>

<bundles_post_ra>
// kernel: tpu_custom_call.1
= control target key start
LH: loop header
LB: loop body
LE: loop exit
PB: predicated region body
PF: predicated region fallthrough
CT: control target
= control target key end

     0   :  { %s1344_s0 = inlined_call_operand.hbm [shape: f32[4,32], index: 0, kind: input, shape index: {}]   ;;  %s1345_s1 = inlined_call_operand.hbm [shape: f32[32,64], index: 1, kind: input, shape index: {}]   ;;  %s1346_s2 = inlined_call_operand.vmem [shape: f32[1,64], index: 2, kind: input, shape index: {}]   ;;  %s1347_s3 = inlined_call_operand.hbm [shape: f32[64,64], index: 3, kind: input, shape index: {}]   ;;  %s1348_s4 = inlined_call_operand.vmem [shape: f32[1,64], index: 4, kind: input, shape index: {}]   ;;  %s1349_s5 = inlined_call_operand.vmem [shape: f32[1,64], index: 5, kind: input, shape index: {}]   ;;  %s1350_s6 = inlined_call_operand.<no memory space> [shape: f32[1,1], index: 6, kind: input, shape index: {}]   ;;  %s1351_s7 = inlined_call_operand.hbm [shape: f32[1,128], index: 7, kind: output, shape index: {}]  }
   0x1   :  { %v12_v0 = vstv %s1350_s6 }
   0x2   :  { %13 = vst [vmem:[#allocation2] sm:$0x1] %v12_v0 }
   0x3   :  { %14 = vsyncpa [#allocation4], 0 }
   0x4   :  { %15 = vsyncpa [#allocation7], 0 }
   0x5   :  { %16 = vsyncpa [#allocation5], 0 }
   0x6   :  { %21 = vsyncadd [#allocation4], 1984  ;;  %s1127_s26 = smov [#allocation6]   ;;  %s1033_s30 = scalar_lea.hbm %s1345_s1, 512 }
   0x7   :  { %s34_s27 = sshll.u32 %s1127_s26, 4  ;;  %p1034_p0 = scmp.ne.s32.totalorder %s1345_s1, %s1033_s30  ;;  %s35_s27 = int_to_ptr.vmem [resolvable:$true] %s34_s27 }
   0x8   :  { %p1037_p1 = scmp.lt.u32.totalorder %s1033_s30, %s1345_s1 }
   0xa   :  { %p1039_p2 = pnand %p1037_p1, %p1034_p0 }
   0xc   :  { %1042 = shalt.err (!%p1039_p2)
}
   0xd   :  { %s1043_s6 = scalar_lea.vmem %s35_s27, 512  ;;  %p1048_p4 = scmp.lt.s32.totalorder %s35_s27, %s35_s27 }
   0xe   :  { %p1044_p3 = scmp.ne.s32.totalorder %s35_s27, %s1043_s6  ;;  %p1049_p5 = scmp.lt.s32.totalorder %s1043_s6, %s1043_s6 }
  0x10   :  { %p1050_p6 = por %p1049_p5, %p1048_p4 }
  0x12   :  { %p1051_p7 = pnand %p1050_p6, %p1044_p3 }
  0x14   :  { %1054 = shalt.err (!%p1051_p7)
}
  0x15   :  { %s1128_s12 = smov 128   ;;  %s1129_s13 = smov 8  }
  0x16   :  { %40 = dma.hbm_to_vmem [thread:$0]  %s1345_s1, 512, %s35_s27, [#allocation7], %s1128_s12, %s1128_s12, %s1129_s13  }
  0x17   :  { %s1130_s16 = smov [#allocation3]   ;;  %s1055_s20 = scalar_lea.hbm %s1344_s0, 64 }
  0x18   :  { %s22_s17 = sshll.u32 %s1130_s16, 4  ;;  %p1056_p8 = scmp.ne.s32.totalorder %s1344_s0, %s1055_s20  ;;  %s23_s17 = int_to_ptr.vmem [resolvable:$true] %s22_s17 }
  0x19   :  { %p1059_p9 = scmp.lt.u32.totalorder %s1055_s20, %s1344_s0 }
  0x1b   :  { %p1061_p10 = pnand %p1059_p9, %p1056_p8 }
  0x1d   :  { %1064 = shalt.err (!%p1061_p10)
}
  0x1e   :  { %s1065_s25 = scalar_lea.vmem %s23_s17, 64  ;;  %s1069_s1 = scalar_lea.vmem %s23_s17, 2048 }
  0x1f   :  { %p1066_p11 = scmp.ne.s32.totalorder %s23_s17, %s1065_s25  ;;  %p1070_p12 = scmp.lt.s32.totalorder %s23_s17, %s23_s17 }
  0x20   :  { %p1071_p13 = scmp.lt.s32.totalorder %s1069_s1, %s1065_s25 }
  0x22   :  { %p1072_p0 = por %p1071_p13, %p1070_p12 }
  0x24   :  { %p1073_p1 = pnand %p1072_p0, %p1066_p11 }
  0x26   :  { %1076 = shalt.err (!%p1073_p1)
}
  0x27   :  { %s1131_s26 = smov 64   ;;  %s1132_s27 = smov 4  }
  0x28   :  { %28 = dma.hbm_to_vmem [thread:$0]  %s1344_s0, 64, %s23_s17, [#allocation4], %s1131_s26, %s1131_s26, %s1132_s27  }
  0x29   :  { %s1133_s30 = smov [#allocation8]   ;;  %s1077_s11 = scalar_lea.hbm %s1347_s3, 1024 }
  0x2a   :  { %s48_s8 = sshll.u32 %s1133_s30, 4  ;;  %p1078_p2 = scmp.ne.s32.totalorder %s1347_s3, %s1077_s11  ;;  %s49_s8 = int_to_ptr.vmem [resolvable:$true] %s48_s8 }
  0x2b   :  { %p1081_p3 = scmp.lt.u32.totalorder %s1077_s11, %s1347_s3 }
  0x2d   :  { %p1083_p4 = pnand %p1081_p3, %p1078_p2 }
  0x2f   :  { %1086 = shalt.err (!%p1083_p4)
}
  0x30   :  { %s1087_s18 = scalar_lea.vmem %s49_s8, 1024  ;;  %p1092_p6 = scmp.lt.s32.totalorder %s49_s8, %s49_s8 }
  0x31   :  { %p1088_p5 = scmp.ne.s32.totalorder %s49_s8, %s1087_s18  ;;  %p1093_p7 = scmp.lt.s32.totalorder %s1087_s18, %s1087_s18 }
  0x33   :  { %p1094_p8 = por %p1093_p7, %p1092_p6 }
  0x35   :  { %p1095_p9 = pnand %p1094_p8, %p1088_p5 }
  0x37   :  { %1098 = shalt.err (!%p1095_p9)
}
  0x38   :  { %54 = dma.hbm_to_vmem [thread:$0]  %s1347_s3, 1024, %s49_s8, [#allocation7], %s1128_s12, %s1128_s12, %s1129_s13  }
  0x39   :  { %1121 = dma.done.wait [#allocation4], 2048  }
  0x3a   :  { %1122 = vsyncadd [#allocation4], 4294965248 }
  0x3b   :  { %1123 = dma.done.wait [#allocation7], 1536  }
  0x3c   :  { %1124 = vsyncadd [#allocation7], 4294965760  ;;  %vm97_vm0 = vcmask 261120   ;;  %v86_v1 = vld [vmem:[#allocation6] sm:$0xff]  ;;  %v87_v2 = vld [vmem:[#allocation6 + $0x8] sm:$0xff]  ;;  %vm322_vm1 = vcmask 523264  }
  0x3d   :  { %v88_v3 = vld [vmem:[#allocation6 + $0x10] sm:$0xff]  ;;  %v900_v4 = vpack.c.bf16 %v87_v2, %v86_v1  ;;  %v89_v5 = vld [vmem:[#allocation6 + $0x18] sm:$0xff]  ;;  %v70_v6 = vld [vmem:[#allocation3] sm:$0xff]  ;;  %vm1135_vm2 = vmmov 0   ;;  %s1138_s20 = smov [#allocation9]  }
  0x3e   :  { %v904_v7 = vpack.c.bf16 %v89_v5, %v88_v3  ;;  %801 = vmatprep.mubr.msk.f32.mxu1 %vm97_vm0, %v70_v6  ;;  %v307_v8 = vld [vmem:[#allocation8] sm:$0xff]  ;;  %v308_v9 = vld [vmem:[#allocation8 + $0x8] sm:$0xff]  ;;  %v309_v10 = vld [vmem:[#allocation8 + $0x10] sm:$0xff]  ;;  %s671_s21 = sshll.u32 %s1138_s20, 4  ;;  %s672_s21 = int_to_ptr.vmem [resolvable:$true] %s671_s21 }
  0x3f   :  { %901 = vmatprep.subr.bf16.mxu1 %v900_v4  ;;  %v310_v11 = vld [vmem:[#allocation8 + $0x18] sm:$0xff]  ;;  %v71_v12 = vld [vmem:[#allocation3 + $0x8] sm:$0xff]  ;;  %v908_v13 = vpack.c.bf16 %v308_v9, %v307_v8  ;;  %v72_v14 = vld [vmem:[#allocation3 + $0x10] sm:$0xff]  ;;  %s1099_s22 = scalar_lea.vmem %s672_s21, 16  ;;  %s1103_s23 = scalar_lea.vmem %s672_s21, 32 }
  0x40   :  { %903 = vmatpush3.bf16.msra.mxu1 %v900_v4  ;;  %v912_v15 = vpack.c.bf16 %v310_v11, %v309_v10  ;;  %v311_v16 = vld [vmem:[#allocation8 + $0x20] sm:$0xff]  ;;  %v312_v17 = vld [vmem:[#allocation8 + $0x28] sm:$0xff]  ;;  %v73_v18 = vld [vmem:[#allocation3 + $0x18] sm:$0xff]  ;;  %p1100_p10 = scmp.ne.s32.totalorder %s672_s21, %s1099_s22  ;;  %p1104_p11 = scmp.lt.s32.totalorder %s672_s21, %s672_s21 }
  0x41   :  { %905 = vmatprep.subr.bf16.mxu1 %v904_v7  ;;  %v74_v19 = vld [vmem:[#allocation3 + $0x20] sm:$0xff]  ;;  %v916_v20 = vpack.c.bf16 %v312_v17, %v311_v16  ;;  %v75_v21 = vld [vmem:[#allocation3 + $0x28] sm:$0xff]  ;;  %v76_v22 = vld [vmem:[#allocation3 + $0x30] sm:$0xff]  ;;  %p1105_p12 = scmp.lt.s32.totalorder %s1103_s23, %s1099_s22 }
  0x42   :  { %v77_v23 = vld [vmem:[#allocation3 + $0x38] sm:$0xff]  ;;  %v78_v24 = vld [vmem:[#allocation3 + $0x40] sm:$0xff]  ;;  %v79_v25 = vld [vmem:[#allocation3 + $0x48] sm:$0xff] }
  0x43   :  { %v80_v26 = vld [vmem:[#allocation3 + $0x50] sm:$0xff]  ;;  %v81_v27 = vld [vmem:[#allocation3 + $0x58] sm:$0xff]  ;;  %v82_v28 = vld [vmem:[#allocation3 + $0x60] sm:$0xff]  ;;  %p1106_p13 = por %p1105_p12, %p1104_p11 }
  0x44   :  { %907 = vmatpush3.bf16.msra.mxu1 %v904_v7  ;;  %v83_v29 = vld [vmem:[#allocation3 + $0x68] sm:$0xff]  ;;  %v84_v30 = vld [vmem:[#allocation3 + $0x70] sm:$0xff]  ;;  %v85_v31 = vld [vmem:[#allocation3 + $0x78] sm:$0xff] }
  0x45   :  { %909 = vmatprep.subr.bf16.mxu1 %v908_v13  ;;  %v313_v32 = vld [vmem:[#allocation8 + $0x30] sm:$0xff]  ;;  %v314_v33 = vld [vmem:[#allocation8 + $0x38] sm:$0xff]  ;;  %vm1292_vm3 = vmpackc.low %vm322_vm1, %vm322_vm1  ;;  %p1107_p0 = pnand %p1106_p13, %p1100_p10 }
  0x46   :  { %v920_v34 = vpack.c.bf16 %v314_v33, %v313_v32  ;;  %v1243_v35 = vld [vmem:[%s1346_s2] ss:$0 sm:$0xff] }
  0x47   :  { %802 = vmatmul.mubr.msk.f32.vlgmr.msra.gmra.mrb[0].mxu1 %vm97_vm0, %v71_v12 }
  0x48   :  { %804 = vmatprep.mubr.msk.f32.mxu1 %vm97_vm0, %v72_v14  ;;  %911 = vmatpush3.bf16.msra.mxu1 %v908_v13 }
  0x49   :  { %913 = vmatprep.subr.bf16.mxu1 %v912_v15 }
  0x4b   :  { %805 = vmatmul.mubr.msk.f32.gmra.mrb[2].mxu1 %vm97_vm0, %v73_v18 }
  0x4c   :  { %807 = vmatprep.mubr.msk.f32.mxu1 %vm97_vm0, %v74_v19  ;;  %915 = vmatpush3.bf16.msra.mxu1 %v912_v15 }
  0x4d   :  { %917 = vmatprep.subr.bf16.mxu1 %v916_v20 }
  0x4f   :  { %808 = vmatmul.mubr.msk.f32.gmra.mrb[4].mxu1 %vm97_vm0, %v75_v21  ;;  %v1136_v21 = vmov 0.0  }
  0x50   :  { %810 = vmatprep.mubr.msk.f32.mxu1 %vm97_vm0, %v76_v22  ;;  %919 = vmatpush3.bf16.msra.mxu1 %v916_v20  ;;  %v1134_v20 = vmov 0.0|0.0   ;;  %v533_v22 = vld [vmem:[#allocation2] sm:$0x1] }
  0x51   :  { %921 = vmatprep.subr.bf16.mxu1 %v920_v34  ;;  %924 = vmatprep.subr.bf16.mxu0 %v1134_v20 }
  0x52   :  { %897 = vmatprep.mubr.msk.f32.mxu0 %vm1135_vm2, %v1136_v21 }
  0x53   :  { %811 = vmatmul.mubr.msk.f32.gmra.mrb[6].mxu1 %vm97_vm0, %v77_v23  ;;  %v1137_v23 = vmov 0  }
  0x54   :  { %813 = vmatprep.mubr.msk.f32.mxu1 %vm97_vm0, %v78_v24  ;;  %923 = vmatpush3.bf16.msra.mxu1 %v920_v34  ;;  %v1281_v24 = vld [vmem:[%s1348_s4] ss:$0 sm:$0xff] }
  0x55   :  { %968 = vset.pattern.permute.xlu0 %v1137_v23 }
  0x56   :  { %536 = vperm.xlu0 %968, %v533_v22  }
  0x57   :  { %814 = vmatmul.mubr.msk.f32.gmra.mrb[8].mxu1 %vm97_vm0, %v79_v25 }
  0x58   :  { %816 = vmatprep.mubr.msk.f32.mxu1 %vm97_vm0, %v80_v26 }
  0x5b   :  { %817 = vmatmul.mubr.msk.f32.gmra.mrb[10].mxu1 %vm97_vm0, %v81_v27 }
  0x5c   :  { %819 = vmatprep.mubr.msk.f32.mxu1 %vm97_vm0, %v82_v28 }
  0x5f   :  { %820 = vmatmul.mubr.msk.f32.gmra.mrb[12].mxu1 %vm97_vm0, %v83_v29 }
  0x60   :  { %822 = vmatprep.mubr.msk.f32.mxu1 %vm97_vm0, %v84_v30 }
  0x63   :  { %823 = vmatmul.mubr.msk.f32.gmra.mrb[14].mxu1 %vm97_vm0, %v85_v31 }
  0xd5   :  { %v537_v23 = vpop.permute.xlu0 %536 }
 0x11a   :  { %v803_v36 = vpop.f32.mrb[0].mxu1 }
 0x11b   :  { %v218_v37 = vadd.f32 %v803_v36, %v1243_v35  ;;  %v212_v38 = vpop.f32.mrb[1].mxu1 }
 0x11c   :  { %v213_v39 = vadd.f32 %v1243_v35, %v212_v38 }
 0x11e   :  { %969 = vtanh.f32 %v213_v39  ;;  %v806_v40 = vpop.f32.mrb[2].mxu1 }
 0x11f   :  { %971 = vtanh.f32 %v218_v37  ;;  %v228_v41 = vadd.f32 %v806_v40, %v1243_v35  ;;  %v222_v42 = vpop.f32.mrb[3].mxu1 }
 0x120   :  { %v223_v43 = vadd.f32 %v1243_v35, %v222_v42 }
 0x121   :  { %973 = vtanh.f32 %v228_v41 }
 0x122   :  { %975 = vtanh.f32 %v223_v43  ;;  %v809_v44 = vpop.f32.mrb[4].mxu1 }
 0x123   :  { %v238_v45 = vadd.f32 %v809_v44, %v1243_v35  ;;  %v232_v46 = vpop.f32.mrb[5].mxu1 }
 0x124   :  { %v233_v47 = vadd.f32 %v1243_v35, %v232_v46 }
 0x125   :  { %977 = vtanh.f32 %v238_v45 }
 0x126   :  { %979 = vtanh.f32 %v233_v47  ;;  %v812_v48 = vpop.f32.mrb[6].mxu1 }
 0x127   :  { %v248_v49 = vadd.f32 %v812_v48, %v1243_v35  ;;  %v242_v50 = vpop.f32.mrb[7].mxu1 }
 0x128   :  { %v970_v51 = vpop.eup %969  ;;  %v243_v52 = vadd.f32 %v1243_v35, %v242_v50 }
 0x129   :  { %v972_v53 = vpop.eup %971  ;;  %841 = vmatprep.mubr.msk.f32.mxu1 %vm322_vm1, %v970_v51  ;;  %981 = vtanh.f32 %v248_v49 }
 0x12a   :  { %842 = vmatmul.mubr.msk.f32.vlgmr.msra.gmra.mrb[16].mxu1 %vm322_vm1, %v972_v53  ;;  %983 = vtanh.f32 %v243_v52  ;;  %v815_v54 = vpop.f32.mrb[8].mxu1 }
 0x12b   :  { %v974_v55 = vpop.eup %973  ;;  %v258_v56 = vadd.f32 %v815_v54, %v1243_v35  ;;  %v252_v57 = vpop.f32.mrb[9].mxu1 }
 0x12c   :  { %v976_v58 = vpop.eup %975  ;;  %v253_v59 = vadd.f32 %v1243_v35, %v252_v57 }
 0x12d   :  { %844 = vmatprep.mubr.msk.f32.mxu1 %vm322_vm1, %v976_v58  ;;  %985 = vtanh.f32 %v258_v56 }
 0x12e   :  { %845 = vmatmul.mubr.msk.f32.gmra.mrb[18].mxu1 %vm322_vm1, %v974_v55  ;;  %987 = vtanh.f32 %v253_v59  ;;  %v818_v60 = vpop.f32.mrb[10].mxu1 }
 0x12f   :  { %v978_v61 = vpop.eup %977  ;;  %v268_v62 = vadd.f32 %v818_v60, %v1243_v35  ;;  %v262_v63 = vpop.f32.mrb[11].mxu1 }
 0x130   :  { %v980_v0 = vpop.eup %979  ;;  %v263_v1 = vadd.f32 %v1243_v35, %v262_v63 }
 0x131   :  { %847 = vmatprep.mubr.msk.f32.mxu1 %vm322_vm1, %v980_v0  ;;  %989 = vtanh.f32 %v268_v62 }
 0x132   :  { %848 = vmatmul.mubr.msk.f32.gmra.mrb[20].mxu1 %vm322_vm1, %v978_v61  ;;  %991 = vtanh.f32 %v263_v1  ;;  %v821_v2 = vpop.f32.mrb[12].mxu1 }
 0x133   :  { %v982_v3 = vpop.eup %981  ;;  %v278_v4 = vadd.f32 %v821_v2, %v1243_v35  ;;  %v272_v5 = vpop.f32.mrb[13].mxu1 }
 0x134   :  { %v984_v6 = vpop.eup %983  ;;  %v273_v7 = vadd.f32 %v1243_v35, %v272_v5 }
 0x135   :  { %850 = vmatprep.mubr.msk.f32.mxu1 %vm322_vm1, %v984_v6  ;;  %993 = vtanh.f32 %v278_v4 }
 0x136   :  { %851 = vmatmul.mubr.msk.f32.gmra.mrb[22].mxu1 %vm322_vm1, %v982_v3  ;;  %995 = vtanh.f32 %v273_v7  ;;  %v824_v8 = vpop.f32.mrb[14].mxu1 }
 0x137   :  { %v986_v9 = vpop.eup %985  ;;  %v288_v10 = vadd.f32 %v824_v8, %v1243_v35  ;;  %v282_v11 = vpop.f32.mrb[15].mxu1 }
 0x138   :  { %v988_v12 = vpop.eup %987  ;;  %v283_v13 = vadd.f32 %v1243_v35, %v282_v11 }
 0x139   :  { %853 = vmatprep.mubr.msk.f32.mxu1 %vm322_vm1, %v988_v12  ;;  %997 = vtanh.f32 %v288_v10 }
 0x13a   :  { %854 = vmatmul.mubr.msk.f32.gmra.mrb[24].mxu1 %vm322_vm1, %v986_v9  ;;  %999 = vtanh.f32 %v283_v13 }
 0x13b   :  { %v990_v14 = vpop.eup %989 }
 0x13c   :  { %v992_v15 = vpop.eup %991 }
 0x13d   :  { %856 = vmatprep.mubr.msk.f32.mxu1 %vm322_vm1, %v992_v15 }
 0x13e   :  { %857 = vmatmul.mubr.msk.f32.gmra.mrb[26].mxu1 %vm322_vm1, %v990_v14 }
 0x13f   :  { %v994_v16 = vpop.eup %993 }
 0x140   :  { %v996_v17 = vpop.eup %995 }
 0x141   :  { %859 = vmatprep.mubr.msk.f32.mxu1 %vm322_vm1, %v996_v17 }
 0x142   :  { %860 = vmatmul.mubr.msk.f32.gmra.mrb[28].mxu1 %vm322_vm1, %v994_v16 }
 0x143   :  { %v998_v18 = vpop.eup %997 }
 0x144   :  { %v1000_v19 = vpop.eup %999 }
 0x145   :  { %862 = vmatprep.mubr.msk.f32.mxu1 %vm322_vm1, %v1000_v19  ;;  %v539_v19 = vlaneseq }
 0x146   :  { %863 = vmatmul.mubr.msk.f32.gmra.mrb[30].mxu1 %vm322_vm1, %v998_v18  ;;  %v532_v18 = vld [vmem:[%s1349_s5] sm:$0x1] }
 0x147   :  { %v540_v21 = vshrl.u32 %v539_v19, 7 }
 0x149   :  { %v541_v22 = vsub.s32 0, %v540_v21 }
 0x1fd   :  { %v843_v25 = vpop.f32.mrb[16].mxu1 }
 0x1fe   :  { %v443_v26 = vadd.f32 %v843_v25, %v1281_v24  ;;  %v437_v27 = vpop.f32.mrb[17].mxu1 }
 0x1ff   :  { %v438_v28 = vadd.f32 %v1281_v24, %v437_v27 }
 0x200   :  { %1001 = vtanh.f32 %v443_v26 }
 0x201   :  { %1003 = vtanh.f32 %v438_v28  ;;  %v846_v29 = vpop.f32.mrb[18].mxu1 }
 0x202   :  { %v453_v30 = vadd.f32 %v846_v29, %v1281_v24  ;;  %v447_v31 = vpop.f32.mrb[19].mxu1 }
 0x203   :  { %v448_v32 = vadd.f32 %v1281_v24, %v447_v31 }
 0x204   :  { %1005 = vtanh.f32 %v453_v30 }
 0x205   :  { %1007 = vtanh.f32 %v448_v32  ;;  %v849_v33 = vpop.f32.mrb[20].mxu1 }
 0x206   :  { %v463_v34 = vadd.f32 %v849_v33, %v1281_v24  ;;  %v457_v35 = vpop.f32.mrb[21].mxu1 }
 0x207   :  { %v458_v36 = vadd.f32 %v1281_v24, %v457_v35 }
 0x208   :  { %1009 = vtanh.f32 %v463_v34 }
 0x209   :  { %1011 = vtanh.f32 %v458_v36  ;;  %v852_v37 = vpop.f32.mrb[22].mxu1 }
 0x20a   :  { %v1002_v38 = vpop.eup %1001  ;;  %v473_v39 = vadd.f32 %v852_v37, %v1281_v24  ;;  %v467_v40 = vpop.f32.mrb[23].mxu1 }
 0x20b   :  { %v1004_v41 = vpop.eup %1003  ;;  %v468_v43 = vadd.f32 %v1281_v24, %v467_v40 }
 0x20c   :  { %v925_v44 = vpack.c.bf16 %v1002_v38, %v1004_v41  ;;  %1013 = vtanh.f32 %v473_v39 }
 0x20d   :  { %1015 = vtanh.f32 %v468_v43  ;;  %v855_v45 = vpop.f32.mrb[24].mxu1 }
 0x20e   :  { %v1006_v46 = vpop.eup %1005  ;;  %927 = vmatpush3.bf16.xpose.msk.msra.mxu0 %vm1292_vm3, %v925_v44  ;;  %v483_v47 = vadd.f32 %v855_v45, %v1281_v24  ;;  %v477_v48 = vpop.f32.mrb[25].mxu1 }
 0x20f   :  { %v1008_v49 = vpop.eup %1007  ;;  %928 = vmatprep.subr.bf16.mxu0 %v1134_v20  ;;  %v478_v50 = vadd.f32 %v1281_v24, %v477_v48 }
 0x210   :  { %v929_v51 = vpack.c.bf16 %v1006_v46, %v1008_v49  ;;  %1017 = vtanh.f32 %v483_v47 }
 0x211   :  { %1019 = vtanh.f32 %v478_v50  ;;  %v858_v52 = vpop.f32.mrb[26].mxu1 }
 0x212   :  { %v1010_v53 = vpop.eup %1009  ;;  %v493_v54 = vadd.f32 %v858_v52, %v1281_v24  ;;  %v487_v55 = vpop.f32.mrb[27].mxu1 }
 0x213   :  { %v1012_v56 = vpop.eup %1011  ;;  %v488_v57 = vadd.f32 %v1281_v24, %v487_v55 }
 0x214   :  { %v933_v58 = vpack.c.bf16 %v1010_v53, %v1012_v56  ;;  %1021 = vtanh.f32 %v493_v54 }
 0x215   :  { %1023 = vtanh.f32 %v488_v57  ;;  %v861_v59 = vpop.f32.mrb[28].mxu1 }
 0x216   :  { %v1014_v60 = vpop.eup %1013  ;;  %931 = vmatpush3.bf16.xpose.msk.msra.mxu0 %vm1292_vm3, %v929_v51  ;;  %v503_v61 = vadd.f32 %v861_v59, %v1281_v24  ;;  %v497_v62 = vpop.f32.mrb[29].mxu1 }
 0x217   :  { %v1016_v63 = vpop.eup %1015  ;;  %932 = vmatprep.subr.bf16.mxu0 %v1134_v20  ;;  %v498_v0 = vadd.f32 %v1281_v24, %v497_v62 }
 0x218   :  { %v937_v1 = vpack.c.bf16 %v1014_v60, %v1016_v63  ;;  %1025 = vtanh.f32 %v503_v61 }
 0x219   :  { %1027 = vtanh.f32 %v498_v0  ;;  %v864_v2 = vpop.f32.mrb[30].mxu1 }
 0x21a   :  { %v1018_v3 = vpop.eup %1017  ;;  %v513_v4 = vadd.f32 %v864_v2, %v1281_v24  ;;  %v507_v5 = vpop.f32.mrb[31].mxu1 }
 0x21b   :  { %v1020_v6 = vpop.eup %1019  ;;  %v508_v7 = vadd.f32 %v1281_v24, %v507_v5  ;;  %v542_v24 = vrot.slane %v537_v23, %v541_v22 }
 0x21c   :  { %v941_v8 = vpack.c.bf16 %v1018_v3, %v1020_v6  ;;  %1029 = vtanh.f32 %v513_v4 }
 0x21d   :  { %1031 = vtanh.f32 %v508_v7 }
 0x21e   :  { %v1022_v9 = vpop.eup %1021  ;;  %935 = vmatpush3.bf16.xpose.msk.msra.mxu0 %vm1292_vm3, %v933_v58 }
 0x21f   :  { %v1024_v10 = vpop.eup %1023  ;;  %936 = vmatprep.subr.bf16.mxu0 %v1134_v20 }
 0x220   :  { %v945_v11 = vpack.c.bf16 %v1022_v9, %v1024_v10 }
 0x222   :  { %v1026_v12 = vpop.eup %1025 }
 0x223   :  { %v1028_v13 = vpop.eup %1027 }
 0x224   :  { %v949_v14 = vpack.c.bf16 %v1026_v12, %v1028_v13 }
 0x226   :  { %v1030_v15 = vpop.eup %1029  ;;  %939 = vmatpush3.bf16.xpose.msk.msra.mxu0 %vm1292_vm3, %v937_v1 }
 0x227   :  { %v1032_v16 = vpop.eup %1031  ;;  %940 = vmatprep.subr.bf16.mxu0 %v1134_v20 }
 0x228   :  { %v953_v17 = vpack.c.bf16 %v1030_v15, %v1032_v16 }
 0x22e   :  { %943 = vmatpush3.bf16.xpose.msk.msra.mxu0 %vm1292_vm3, %v941_v8 }
 0x22f   :  { %944 = vmatprep.subr.bf16.mxu0 %v1134_v20 }
 0x236   :  { %947 = vmatpush3.bf16.xpose.msk.msra.mxu0 %vm1292_vm3, %v945_v11 }
 0x237   :  { %948 = vmatprep.subr.bf16.mxu0 %v1134_v20 }
 0x23e   :  { %951 = vmatpush3.bf16.xpose.msk.msra.mxu0 %vm1292_vm3, %v949_v14 }
 0x23f   :  { %952 = vmatprep.subr.bf16.mxu0 %v1134_v20 }
 0x246   :  { %955 = vmatpush3.bf16.xpose.msk.msra.mxu0 %vm1292_vm3, %v953_v17 }
 0x24d   :  { %898 = vmatmul.mubr.msk.f32.vlgmr.msra.gmra.mrb[0].mxu0 %vm322_vm1, %v532_v18 }
 0x320   :  { %v660_v25 = vpop.f32.mrb[0].mxu0 }
 0x321   :  { %v661_v26 = vadd.f32 %v660_v25, %v542_v24  ;;  %v899_v27 = vpop.f32.mrb[1].mxu0 }
 0x323   :  { %664 = vst [vmem:[#allocation9] sm:$0x1] %v661_v26 }
 0x324   :  { %1110 = shalt.err (!%p1107_p0)
}
 0x325   :  { %s1111_s25 = scalar_lea.hbm %s1351_s7, 16 }
 0x326   :  { %p1112_p1 = scmp.ne.s32.totalorder %s1351_s7, %s1111_s25  ;;  %p1115_p2 = scmp.lt.u32.totalorder %s1111_s25, %s1351_s7 }
 0x328   :  { %p1117_p3 = pnand %p1115_p2, %p1112_p1 }
 0x32a   :  { %1120 = shalt.err (!%p1117_p3)
}
 0x32b   :  { %674 = dma.vmem_to_hbm [thread:$0]  %s672_s21, 16, %s1351_s7, [#allocation5]  }
 0x32c   :  { %1125 = dma.done.wait [#allocation5], 16  }
 0x32d   :  { %1126 = vsyncadd [#allocation5], 4294967280 }
 0x32e   :  { %678 = vsyncpa [#allocation4], 1 }
 0x32f   :  { %679 = vsyncpa [#allocation7], 1 }
 0x330   :  { %680 = vsyncpa [#allocation5], 1 }

</bundles_post_ra>
